<compile_context>
chip_gen: v7x
topology: tpu7x:2x2x1
jax: 0.10.0
libtpu: 0.0.40
codegen_flags: <defaults>
</compile_context>

<pallas_src>
import functools

import jax
import jax.numpy as jnp
from jax.experimental import pallas as pl
from jax.experimental.pallas import tpu as pltpu

EPS = 1e-5


def _round_up(x, m):
    return ((x + m - 1) // m) * m


def _layernorm_kernel(x_ref, w_ref, *rest, has_bias):
    # x_ref: (tile_rows, hidden); w_ref / b_ref: (1, hidden)
    if has_bias:
        b_ref, o_ref = rest
    else:
        (o_ref,) = rest
        b_ref = None

    x = x_ref[...].astype(jnp.float32)
    inv_h = 1.0 / float(x.shape[-1])  # block last dim == true hidden

    # Two-pass (centered) variance: no mask needed since there is no lane
    # padding, and it avoids the cancellation risk of sum(x^2) - mean^2.
    mean = jnp.sum(x, axis=-1, keepdims=True) * inv_h
    centered = x - mean
    var = jnp.sum(centered * centered, axis=-1, keepdims=True) * inv_h
    inv = jax.lax.rsqrt(var + EPS)

    y = centered * inv * w_ref[...].astype(jnp.float32)
    if has_bias:
        y = y + b_ref[...].astype(jnp.float32)
    o_ref[...] = y.astype(o_ref.dtype)


def _num_tensorcores(vmem_cap):
    """Best-effort TC-per-chip count (v7x = 2, v5e/v6e = 1)."""
    try:
        info = pltpu.get_tpu_info()
        for attr in ("num_tensorcores", "tensorcore_count", "num_cores"):
            v = getattr(info, attr, None)
            if isinstance(v, int) and v > 0:
                return v
    except Exception:
        pass
    # Heuristic: 64 MiB-per-core chips (v7x) have 2 TCs; 128 MiB chips have 1.
    return 2 if vmem_cap <= (64 << 20) else 1


def _choose_tile_rows(rows, hidden, itemsize, vmem_cap, num_tc):
    """Row tile sized for ~6 MiB x blocks, with a VMEM-budget guard."""
    row_mult = 8 * max(1, 4 // itemsize)  # 8 (f32), 16 (bf16), 32 (int8/fp8)
    bytes_per_row = max(1, hidden * itemsize)

    # ~6 MiB blocks keep the ~0.35 us/step fixed overhead under ~10% even at
    # 3.2 TB/s HBM (v7x), and comfortably hide it on v5e/v6e.
    target_block_bytes = 6 << 20
    t = max(row_mult, (target_block_bytes // bytes_per_row) // row_mult * row_mult)

    # VMEM guard: 2x-in + 2x-out double buffers + ~3 f32-sized temporaries must
    # stay well under the per-core VMEM capacity (hits v7x's 64 MiB first).
    def vmem_est(tr):
        return 4 * tr * hidden * itemsize + 3 * tr * hidden * 4 + (2 << 20)

    while t > row_mult and vmem_est(t) > vmem_cap // 2:
        t = max(row_mult, ((t // 2) // row_mult) * row_mult)
    # TODO(synk): if hidden is so large that even an 8-row block overflows VMEM
    # (hidden in the hundreds of thousands), tile hidden as a second
    # "arbitrary" grid axis and accumulate sum / sum-of-squares in scratch.

    if rows <= t:
        # Whole input fits in one target-sized block.
        if num_tc >= 2 and rows >= 4 * row_mult:
            # 2-TC chips (v7x): aim for >=4 grid steps so each core gets >=2
            # steps and per-core DMA/compute pipelining is live.
            tr = _round_up(pl.cdiv(rows, 4), row_mult)
            return min(tr, rows)
        # 1-TC chips / tiny inputs: a single block (block dim == full rows dim
        # is always legal), no extra grid-step overhead.
        return rows

    return t


def layer_norm(x, weight, bias=None):
    """LayerNorm over last dim, matching F.layer_norm(x, (H,), weight, bias, 1e-5)."""
    orig_shape = x.shape
    hidden = orig_shape[-1]
    rows = 1
    for d in orig_shape[:-1]:
        rows *= d
    x2 = x.reshape(rows, hidden)

    itemsize = jnp.dtype(x.dtype).itemsize
    try:
        vmem_cap = int(pltpu.get_tpu_info().vmem_capacity_bytes)
    except Exception:
        vmem_cap = 128 << 20
    num_tc = _num_tensorcores(vmem_cap)

    tile_rows = _choose_tile_rows(rows, hidden, itemsize, vmem_cap, num_tc)
    grid = (pl.cdiv(rows, tile_rows),)  # ragged last block is masked by Pallas
    has_bias = bias is not None

    # TODO(synk): for hidden << 128, pack k = 128 // hidden rows per lane-row
    # with segmented reductions to recover lane-dense stores / full HBM BW.

    in_arrays = [x2, weight.reshape(1, hidden)]
    in_specs = [
        pl.BlockSpec((tile_rows, hidden), lambda i: (i, 0)),
        pl.BlockSpec((1, hidden), lambda i: (0, 0)),
    ]
    if has_bias:
        in_arrays.append(bias.reshape(1, hidden))
        in_specs.append(pl.BlockSpec((1, hidden), lambda i: (0, 0)))

    # VMEM budget: double-buffered in + out blocks, plus f32 intermediates.
    block_bytes = tile_rows * hidden * itemsize
    vmem_needed = 4 * block_bytes + 3 * tile_rows * hidden * 4 + (2 << 20)
    vmem_limit = int(min(max(vmem_needed, 16 << 20), int(vmem_cap * 0.75)))

    cost = pl.CostEstimate(
        flops=7 * rows * hidden,
        transcendentals=rows,
        bytes_accessed=2 * rows * hidden * itemsize
        + (2 if has_bias else 1) * hidden * jnp.dtype(weight.dtype).itemsize,
    )

    kernel = functools.partial(_layernorm_kernel, has_bias=has_bias)

    out = pl.pallas_call(
        kernel,
        out_shape=jax.ShapeDtypeStruct((rows, hidden), x.dtype),
        grid_spec=pltpu.PrefetchScalarGridSpec(
            num_scalar_prefetch=0,
            grid=grid,
            in_specs=in_specs,
            out_specs=pl.BlockSpec((tile_rows, hidden), lambda i: (i, 0)),
        ),
        compiler_params=pltpu.CompilerParams(
            dimension_semantics=("parallel",),
            vmem_limit_bytes=vmem_limit,
        ),
        cost_estimate=cost,
    )(*in_arrays)

    return out.reshape(orig_shape)


if __name__ == "__main__":
    key = jax.random.PRNGKey(0)
    batch, seq, hidden = 2, 8, 32

    kx, _, _ = jax.random.split(key, 3)
    x = jax.random.normal(kx, (batch, seq, hidden), dtype=jnp.float32)

    # Deterministic params matching nn.Module __init__: weight=ones, bias=zeros.
    weight = jnp.ones((hidden,), dtype=jnp.float32)
    bias = jnp.zeros((hidden,), dtype=jnp.float32)

    y = jax.block_until_ready(layer_norm(x, weight, bias))
    # bias=False path (LayerNorm(ndim, bias=False)) — no bias array DMA'd.
    y_nobias = jax.block_until_ready(layer_norm(x, weight, None))

    # Correctness check vs plain-JAX reference.
    mean = jnp.mean(x, axis=-1, keepdims=True)
    var = jnp.mean((x - mean) ** 2, axis=-1, keepdims=True)
    ref = (x - mean) * jax.lax.rsqrt(var + EPS) * weight + bias
    assert jnp.allclose(y, ref, atol=1e-5, rtol=1e-5), "mismatch vs reference"
    assert jnp.allclose(y_nobias, ref, atol=1e-5, rtol=1e-5), "mismatch (no-bias) vs reference"

    print("KERNEL_OK")
</pallas_src>

<mosaic_0001>
module attributes {stable_mosaic.version = 11 : i64} {
  func.func @_layernorm_kernel(%arg0: i32, %arg1: memref<16x32xf32, #tpu.memory_space<vmem>>, %arg2: memref<1x32xf32, #tpu.memory_space<vmem>>, %arg3: memref<1x32xf32, #tpu.memory_space<vmem>>, %arg4: memref<16x32xf32, #tpu.memory_space<vmem>>) attributes {dimension_semantics = [#tpu.dimension_semantics<parallel>], iteration_bounds = array<i64: 1>, scalar_prefetch = 0 : i64, scratch_operands = 0 : i64, tpu.core_type = #tpu.core_type<tc>, window_params = [{transform_indices = @transform_0, window_bounds = array<i64: 16, 32>}, {pipeline_mode = #tpu.pipeline_mode<synchronous>, transform_indices = @transform_1, window_bounds = array<i64: 1, 32>}, {pipeline_mode = #tpu.pipeline_mode<synchronous>, transform_indices = @transform_2, window_bounds = array<i64: 1, 32>}, {transform_indices = @transform_3, window_bounds = array<i64: 16, 32>}]} {
    %c0 = arith.constant 0 : index
    %c0_0 = arith.constant 0 : index
    %0 = vector.load %arg1[%c0, %c0_0] : memref<16x32xf32, #tpu.memory_space<vmem>>, vector<16x32xf32>
    %cst = arith.constant dense<0.000000e+00> : vector<16xf32>
    %1 = vector.multi_reduction <add>, %0, %cst [1] : vector<16x32xf32> to vector<16xf32>
    %2 = vector.shape_cast %1 : vector<16xf32> to vector<16x1xf32>
    %cst_1 = arith.constant 3.125000e-02 : f32
    %3 = vector.broadcast %cst_1 : f32 to vector<16x1xf32>
    %4 = arith.mulf %2, %3 : vector<16x1xf32>
    %5 = vector.broadcast %4 : vector<16x1xf32> to vector<16x32xf32>
    %6 = arith.subf %0, %5 : vector<16x32xf32>
    %7 = arith.mulf %6, %6 : vector<16x32xf32>
    %cst_2 = arith.constant dense<0.000000e+00> : vector<16xf32>
    %8 = vector.multi_reduction <add>, %7, %cst_2 [1] : vector<16x32xf32> to vector<16xf32>
    %9 = vector.shape_cast %8 : vector<16xf32> to vector<16x1xf32>
    %cst_3 = arith.constant 3.125000e-02 : f32
    %10 = vector.broadcast %cst_3 : f32 to vector<16x1xf32>
    %11 = arith.mulf %9, %10 : vector<16x1xf32>
    %cst_4 = arith.constant 9.99999974E-6 : f32
    %12 = vector.broadcast %cst_4 : f32 to vector<16x1xf32>
    %13 = arith.addf %11, %12 : vector<16x1xf32>
    %14 = math.rsqrt %13 : vector<16x1xf32>
    %15 = vector.broadcast %14 : vector<16x1xf32> to vector<16x32xf32>
    %16 = arith.mulf %6, %15 : vector<16x32xf32>
    %c0_5 = arith.constant 0 : index
    %c0_6 = arith.constant 0 : index
    %17 = vector.load %arg2[%c0_5, %c0_6] : memref<1x32xf32, #tpu.memory_space<vmem>>, vector<1x32xf32>
    %18 = vector.broadcast %17 : vector<1x32xf32> to vector<16x32xf32>
    %19 = arith.mulf %16, %18 : vector<16x32xf32>
    %c0_7 = arith.constant 0 : index
    %c0_8 = arith.constant 0 : index
    %20 = vector.load %arg3[%c0_7, %c0_8] : memref<1x32xf32, #tpu.memory_space<vmem>>, vector<1x32xf32>
    %21 = vector.broadcast %20 : vector<1x32xf32> to vector<16x32xf32>
    %22 = arith.addf %19, %21 : vector<16x32xf32>
    %c0_9 = arith.constant 0 : index
    %c0_10 = arith.constant 0 : index
    %23 = vector.load %arg4[%c0_9, %c0_10] : memref<16x32xf32, #tpu.memory_space<vmem>>, vector<16x32xf32>
    tpu.vector_store %arg4[%c0_9, %c0_10], %22 {strides = array<i32>} : memref<16x32xf32, #tpu.memory_space<vmem>>, vector<16x32xf32>,
    return
  }
  func.func @transform_0(%arg0: i32) -> (i32, i32) {
    %c0_i32 = arith.constant 0 : i32
    %c0_i32_0 = arith.constant 0 : i32
    return %arg0, %c0_i32 : i32, i32
  }
  func.func @transform_1(%arg0: i32) -> (i32, i32) {
    %c0_i32 = arith.constant 0 : i32
    %c0_i32_0 = arith.constant 0 : i32
    %c0_i32_1 = arith.constant 0 : i32
    return %c0_i32, %c0_i32_0 : i32, i32
  }
  func.func @transform_2(%arg0: i32) -> (i32, i32) {
    %c0_i32 = arith.constant 0 : i32
    %c0_i32_0 = arith.constant 0 : i32
    %c0_i32_1 = arith.constant 0 : i32
    return %c0_i32, %c0_i32_0 : i32, i32
  }
  func.func @transform_3(%arg0: i32) -> (i32, i32) {
    %c0_i32 = arith.constant 0 : i32
    %c0_i32_0 = arith.constant 0 : i32
    return %arg0, %c0_i32 : i32, i32
  }
}

</mosaic_0001>

<bundles_post_ra>
// kernel: tpu_custom_call.1
= control target key start
LH: loop header
LB: loop body
LE: loop exit
PB: predicated region body
PF: predicated region fallthrough
CT: control target
= control target key end

     0   :  { %8 = vsyncpa [#allocation3], 0  ;;  %s219_s0 = inlined_call_operand.hbm [shape: f32[16,32], index: 0, kind: input, shape index: {}]   ;;  %s220_s1 = inlined_call_operand.vmem [shape: f32[1,32], index: 1, kind: input, shape index: {}]   ;;  %s221_s2 = inlined_call_operand.vmem [shape: f32[1,32], index: 2, kind: input, shape index: {}]   ;;  %s222_s3 = inlined_call_operand.hbm [shape: f32[16,32], index: 3, kind: output, shape index: {}]  }
   0x1   :  { %9 = vsyncpa [#allocation4], 0  ;;  %s153_s12 = smov [#allocation2]   ;;  %s105_s16 = scalar_lea.hbm %s219_s0, 256 }
   0x2   :  { %s15_s13 = sshll.u32 %s153_s12, 4  ;;  %p106_p0 = scmp.ne.s32.totalorder %s219_s0, %s105_s16  ;;  %s16_s13 = int_to_ptr.vmem [resolvable:$true] %s15_s13 }
   0x3   :  { %p109_p1 = scmp.lt.u32.totalorder %s105_s16, %s219_s0 }
   0x5   :  { %p111_p2 = pnand %p109_p1, %p106_p0 }
   0x7   :  { %114 = shalt.err (!%p111_p2)
}
   0x8   :  { %s115_s21 = scalar_lea.vmem %s16_s13, 256  ;;  %p120_p4 = scmp.lt.s32.totalorder %s16_s13, %s16_s13 }
   0x9   :  { %p116_p3 = scmp.ne.s32.totalorder %s16_s13, %s115_s21  ;;  %p121_p5 = scmp.lt.s32.totalorder %s115_s21, %s115_s21 }
   0xb   :  { %p122_p6 = por %p121_p5, %p120_p4 }
   0xd   :  { %p123_p7 = pnand %p122_p6, %p116_p3 }
   0xf   :  { %126 = shalt.err (!%p123_p7)
}
  0x10   :  { %s154_s22 = smov 128   ;;  %s155_s23 = smov 8  }
  0x11   :  { %21 = dma.hbm_to_vmem [thread:$0]  %s219_s0, 256, %s16_s13, [#allocation3], %s154_s22, %s154_s22, %s155_s23  }
  0x12   :  { %149 = dma.done.wait [#allocation3], 256  }
  0x13   :  { %150 = vsyncadd [#allocation3], 4294967040  ;;  %vm31_vm0 = vcmask 261120   ;;  %v29_v0 = vld [vmem:[#allocation2] sm:$0xff]  ;;  %v30_v1 = vld [vmem:[#allocation2 + $0x8] sm:$0xff]  ;;  %s156_s29 = smov [#allocation5]  }
  0x14   :  { %v32_v2 = vsel %vm31_vm0, %v29_v0, 0.0  ;;  %v35_v3 = vsel %vm31_vm0, %v30_v1, 0.0  ;;  %v95_v21 = vld [vmem:[%s220_s1] ss:$0 sm:$0xff]  ;;  %s83_s30 = sshll.u32 %s156_s29, 4  ;;  %s84_s30 = int_to_ptr.vmem [resolvable:$true] %s83_s30 }
  0x15   :  { %33 = vadd.xlane.f32.xlu0 %v32_v2  ;;  %v96_v23 = vld [vmem:[%s221_s2] ss:$0 sm:$0xff]  ;;  %s127_s4 = scalar_lea.vmem %s84_s30, 256  ;;  %p132_p9 = scmp.lt.s32.totalorder %s84_s30, %s84_s30 }
  0x16   :  { %p128_p8 = scmp.ne.s32.totalorder %s84_s30, %s127_s4  ;;  %p133_p10 = scmp.lt.s32.totalorder %s127_s4, %s127_s4 }
  0x18   :  { %p134_p11 = por %p133_p10, %p132_p9 }
  0x19   :  { %36 = vadd.xlane.f32.xlu0 %v35_v3 }
  0x1a   :  { %p135_p12 = pnand %p134_p11, %p128_p8 }
  0xa2   :  { %v34_v4 = vpop.xlane.xlu0 %33 }
  0xa3   :  { %v38_v5 = vmul.f32 0.03125, %v34_v4 }
  0xa5   :  { %v40_v6 = vsub.f32 %v29_v0, %v38_v5 }
  0xa6   :  { %v37_v7 = vpop.xlane.xlu0 %36 }
  0xa7   :  { %v39_v8 = vmul.f32 0.03125, %v37_v7  ;;  %v42_v9 = vmul.f32 %v40_v6, %v40_v6 }
  0xa9   :  { %v41_v10 = vsub.f32 %v30_v1, %v39_v8  ;;  %v44_v11 = vsel %vm31_vm0, %v42_v9, 0.0 }
  0xaa   :  { %45 = vadd.xlane.f32.xlu1 %v44_v11 }
  0xab   :  { %v43_v12 = vmul.f32 %v41_v10, %v41_v10 }
  0xad   :  { %v47_v13 = vsel %vm31_vm0, %v43_v12, 0.0 }
  0xae   :  { %48 = vadd.xlane.f32.xlu1 %v47_v13 }
 0x137   :  { %v46_v14 = vpop.xlane.xlu1 %45 }
 0x138   :  { %v50_v15 = vmul.f32 0.03125, %v46_v14 }
 0x13a   :  { %v52_v16 = vadd.f32 1e-05, %v50_v15 }
 0x13b   :  { %v49_v17 = vpop.xlane.xlu1 %48 }
 0x13c   :  { %101 = vrsqrt.f32 %v52_v16  ;;  %v51_v18 = vmul.f32 0.03125, %v49_v17 }
 0x13e   :  { %v53_v19 = vadd.f32 1e-05, %v51_v18 }
 0x140   :  { %103 = vrsqrt.f32 %v53_v19 }
 0x146   :  { %v102_v20 = vpop.eup %101 }
 0x147   :  { %v56_v22 = vmul.f32 %v102_v20, %v40_v6 }
 0x149   :  { %v65_v24 = vmul.f32 %v95_v21, %v56_v22 }
 0x14a   :  { %v104_v25 = vpop.eup %103 }
 0x14b   :  { %v57_v26 = vmul.f32 %v104_v25, %v41_v10  ;;  %v74_v27 = vadd.f32 %v96_v23, %v65_v24 }
 0x14d   :  { %v66_v28 = vmul.f32 %v95_v21, %v57_v26  ;;  %76 = vst.msk [vmem:[#allocation5] sm:$0xff] %vm31_vm0, %v74_v27 }
 0x14f   :  { %v75_v29 = vadd.f32 %v96_v23, %v66_v28 }
 0x151   :  { %77 = vst.msk [vmem:[#allocation5 + $0x8] sm:$0xff] %vm31_vm0, %v75_v29 }
 0x152   :  { %138 = shalt.err (!%p135_p12)
}
 0x153   :  { %s139_s5 = scalar_lea.hbm %s222_s3, 256 }
 0x154   :  { %p140_p13 = scmp.ne.s32.totalorder %s222_s3, %s139_s5  ;;  %p143_p0 = scmp.lt.u32.totalorder %s139_s5, %s222_s3 }
 0x156   :  { %p145_p1 = pnand %p143_p0, %p140_p13 }
 0x158   :  { %148 = shalt.err (!%p145_p1)
}
 0x159   :  { %89 = dma.vmem_to_hbm [thread:$0]  %s84_s30, 256, %s222_s3, [#allocation4], %s154_s22, %s154_s22, %s155_s23  }
 0x15a   :  { %151 = dma.done.wait [#allocation4], 256  }
 0x15b   :  { %152 = vsyncadd [#allocation4], 4294967040 }
 0x15c   :  { %93 = vsyncpa [#allocation3], 1 }
 0x15d   :  { %94 = vsyncpa [#allocation4], 1 }

</bundles_post_ra>
